<compile_context>
chip_gen: v7x
topology: tpu7x:2x2x1
jax: 0.10.0
libtpu: 0.0.40
codegen_flags: <defaults>
</compile_context>

<pallas_src>
import functools

import numpy as np
import jax
import jax.numpy as jnp
from jax.experimental import pallas as pl
from jax.experimental.pallas import tpu as pltpu

# BaseDataset.MEAN / BaseDataset.STD (ImageNet statistics).
MEAN = (0.485, 0.456, 0.406)
STD = (0.229, 0.224, 0.225)


# --------------------------------------------------------------------------
# Bilinear resize weight matrices (F.interpolate, align_corners=False).
# --------------------------------------------------------------------------
def _bilinear_weight_matrix(out_size, in_size):
    w = np.zeros((out_size, in_size), np.float32)
    scale = in_size / out_size
    for i in range(out_size):
        src = max(0.0, (i + 0.5) * scale - 0.5)
        i0 = min(int(np.floor(src)), in_size - 1)
        i1 = min(i0 + 1, in_size - 1)
        l1 = src - i0
        w[i, i0] += 1.0 - l1
        w[i, i1] += l1
    return jnp.asarray(w)


def _default_vmem_budget():
    """Per-generation double-buffered VMEM budget for band sizing."""
    try:
        cap = int(pltpu.get_tpu_info().vmem_capacity_bytes)
        # ~35% of physical VMEM: ~22 MiB on v7x (64 MiB), ~45 MiB on v5e/v6e (128 MiB).
        return max(8 << 20, min(int(cap * 0.35), 48 << 20))
    except Exception:
        return 20 << 20


def _largest_band(total, max_rows, align):
    """Largest multiple-of-`align` divisor of `total` that is <= max_rows."""
    max_rows = int(min(total, max_rows))
    if max_rows >= total:
        return total
    best = None
    r = align
    while r <= max_rows:
        if total % r == 0:
            best = r
        r += align
    return best if best is not None else total  # fallback: single untiled band


# --------------------------------------------------------------------------
# Fully fused single-call kernel (small images, e.g. 128x128 default config).
# p = [w_lo(3), b_lo, w_hi(3), b_hi]; w_hm (coarse-mask weight) folded into uxT.
# --------------------------------------------------------------------------
def _fused_kernel(x_ref, wy_ref, wxT_ref, uy_ref, uxT_ref, p_ref, cmask_ref,
                  o_ref, *, tail_rows):
    cd = wy_ref.dtype
    x0, x1, x2 = x_ref[0], x_ref[1], x_ref[2]

    # low branch: downsample (channel combine hoisted) -> head -> sigmoid
    xc_lo = (p_ref[0] * x0 + p_ref[1] * x1 + p_ref[2] * x2).astype(cd)
    acc = jnp.dot(wy_ref[...], xc_lo, preferred_element_type=jnp.float32)       # (low_h, W)
    z = jnp.dot(acc.astype(cd), wxT_ref[...],
                preferred_element_type=jnp.float32) + p_ref[3]                  # (low_h, low_w)
    m = jax.nn.sigmoid(z)

    # lane-dense upsample: (m @ uxT) first, then uy @ (.)
    mu = jnp.dot(m.astype(cd), uxT_ref[...], preferred_element_type=jnp.float32)  # (low_h, W)
    coarse = jnp.dot(uy_ref[...], mu.astype(cd),
                     preferred_element_type=jnp.float32)                          # (H, W)

    # high head (all normalizations folded into p / uxT)
    xc_hi = p_ref[4] * x0 + p_ref[5] * x1 + p_ref[6] * x2 + p_ref[7]
    o_ref[0] = jax.nn.sigmoid(xc_hi + coarse) * cmask_ref[...]

    if tail_rows > 0:   # reference never covers the last row (min(h-1, ...))
        rows, cols = o_ref.shape[1], o_ref.shape[2]
        o_ref[:, rows - tail_rows:, :] = jnp.zeros((1, tail_rows, cols), o_ref.dtype)


def _fused_forward(image, wy, wxT, uy, uxT, p, cmask, *, tail_rows, vmem_limit):
    C, H, W = image.shape
    kernel = functools.partial(_fused_kernel, tail_rows=tail_rows)
    return pl.pallas_call(
        kernel,
        out_shape=jax.ShapeDtypeStruct((1, H, W), jnp.float32),
        in_specs=[
            pl.BlockSpec(image.shape, lambda: (0, 0, 0)),
            pl.BlockSpec(wy.shape, lambda: (0, 0)),
            pl.BlockSpec(wxT.shape, lambda: (0, 0)),
            pl.BlockSpec(uy.shape, lambda: (0, 0)),
            pl.BlockSpec(uxT.shape, lambda: (0, 0)),
            pl.BlockSpec(memory_space=pltpu.MemorySpace.SMEM),
            pl.BlockSpec(cmask.shape, lambda: (0, 0)),
        ],
        out_specs=pl.BlockSpec((1, H, W), lambda: (0, 0, 0)),
        compiler_params=pltpu.CompilerParams(vmem_limit_bytes=vmem_limit),
    )(image, wy, wxT, uy, uxT, p, cmask)


# --------------------------------------------------------------------------
# Kernel 1 (banded path): low-branch downsample tiled over H row-bands with a
# (low_h, W) accumulator; also stashes the high-head channel combine xc_hi so
# the band kernel never re-reads the 3-channel image.  Output `mu` already has
# the coarse-mask weight folded in (uxT is pre-scaled by w_hm).
# --------------------------------------------------------------------------
def _low_prep_kernel(x_ref, wy_ref, wxT_ref, uxT_ref, p_ref, xchi_ref, mu_ref,
                     acc_ref):
    i = pl.program_id(0)

    @pl.when(i == 0)
    def _init():
        acc_ref[...] = jnp.zeros_like(acc_ref)

    cd = wy_ref.dtype
    x0, x1, x2 = x_ref[0], x_ref[1], x_ref[2]
    xc_lo = (p_ref[0] * x0 + p_ref[1] * x1 + p_ref[2] * x2).astype(cd)
    acc_ref[...] += jnp.dot(wy_ref[...], xc_lo, preferred_element_type=jnp.float32)

    # high-head image term (ImageNet normalize + bias folded); 1 channel out.
    xchi_ref[0] = p_ref[4] * x0 + p_ref[5] * x1 + p_ref[6] * x2 + p_ref[7]

    @pl.when(i == pl.num_programs(0) - 1)
    def _finalize():
        z = jnp.dot(acc_ref[...].astype(cd), wxT_ref[...],
                    preferred_element_type=jnp.float32) + p_ref[3]
        m = jax.nn.sigmoid(z)                                   # (low_h, low_w)
        mu_ref[...] = jnp.dot(m.astype(cd), uxT_ref[...],
                              preferred_element_type=jnp.float32).astype(mu_ref.dtype)


def _low_prep(image, wy, wxT, uxT, p, *, rows, out_dtype, vmem_limit):
    C, H, W = image.shape
    low_h = wy.shape[0]
    n = H // rows
    return pl.pallas_call(
        _low_prep_kernel,
        out_shape=(jax.ShapeDtypeStruct((1, H, W), jnp.float32),
                   jax.ShapeDtypeStruct((low_h, W), out_dtype)),
        grid=(n,),
        in_specs=[
            pl.BlockSpec((C, rows, W), lambda i: (0, i, 0)),
            pl.BlockSpec((low_h, rows), lambda i: (0, i)),      # rows multiple of 128
            pl.BlockSpec(wxT.shape, lambda i: (0, 0)),
            pl.BlockSpec(uxT.shape, lambda i: (0, 0)),
            pl.BlockSpec(memory_space=pltpu.MemorySpace.SMEM),
        ],
        out_specs=[
            pl.BlockSpec((1, rows, W), lambda i: (0, i, 0)),
            pl.BlockSpec((low_h, W), lambda i: (0, 0)),         # revisited accumulator output
        ],
        scratch_shapes=[pltpu.VMEM((low_h, W), jnp.float32)],
        compiler_params=pltpu.CompilerParams(
            dimension_semantics=("arbitrary",), vmem_limit_bytes=vmem_limit),
    )(image, wy, wxT, uxT, p)


# --------------------------------------------------------------------------
# Kernel 2 (banded path): per row-band, upsample the low-res mask in-VMEM and
# apply the high head.  Pointwise apart from one small matmul, so the band
# height is decoupled from step_size and sized to the VMEM budget.
# --------------------------------------------------------------------------
def _fine_band_kernel(xchi_ref, mu_ref, uy_ref, cmask_ref, o_ref, *, tail_rows):
    coarse = jnp.dot(uy_ref[...], mu_ref[...], preferred_element_type=jnp.float32)
    o_ref[0] = jax.nn.sigmoid(xchi_ref[0] + coarse) * cmask_ref[...]
    if tail_rows > 0:
        @pl.when(pl.program_id(0) == pl.num_programs(0) - 1)
        def _zero_tail():
            rows, cols = o_ref.shape[1], o_ref.shape[2]
            o_ref[:, rows - tail_rows:, :] = jnp.zeros((1, tail_rows, cols), o_ref.dtype)


def _fine_bands(xchi, mu, uy, cmask, *, rows, tail_rows, vmem_limit):
    _, H, W = xchi.shape
    low_h = mu.shape[0]
    n = H // rows
    kernel = functools.partial(_fine_band_kernel, tail_rows=tail_rows)
    return pl.pallas_call(
        kernel,
        out_shape=jax.ShapeDtypeStruct((1, H, W), jnp.float32),
        grid=(n,),
        in_specs=[
            pl.BlockSpec((1, rows, W), lambda i: (0, i, 0)),
            pl.BlockSpec(mu.shape, lambda i: (0, 0)),
            pl.BlockSpec((rows, low_h), lambda i: (i, 0)),
            pl.BlockSpec(cmask.shape, lambda i: (0, 0)),
        ],
        out_specs=pl.BlockSpec((1, rows, W), lambda i: (0, i, 0)),
        compiler_params=pltpu.CompilerParams(
            dimension_semantics=("parallel",), vmem_limit_bytes=vmem_limit),
    )(xchi, mu, uy, cmask)


# --------------------------------------------------------------------------
# Generic single-channel bilinear resize (only used if the final resize is not
# an identity; here orig size == tensor size so it is skipped).
# --------------------------------------------------------------------------
def _resize_1ch_kernel(x_ref, ry_ref, rxT_ref, o_ref):
    t = jnp.dot(ry_ref[...], x_ref[0], preferred_element_type=jnp.float32)
    o_ref[0] = jnp.dot(t, rxT_ref[...], preferred_element_type=jnp.float32)


def bilinear_resize_1ch(x, out_h, out_w):
    _, H, W = x.shape
    ry = _bilinear_weight_matrix(out_h, H)
    rxT = _bilinear_weight_matrix(out_w, W).T
    return pl.pallas_call(
        _resize_1ch_kernel,
        out_shape=jax.ShapeDtypeStruct((1, out_h, out_w), jnp.float32),
        in_specs=[
            pl.BlockSpec((1, H, W), lambda: (0, 0, 0)),
            pl.BlockSpec((out_h, H), lambda: (0, 0)),
            pl.BlockSpec((W, out_w), lambda: (0, 0)),
        ],
        out_specs=pl.BlockSpec((1, out_h, out_w), lambda: (0, 0, 0)),
    )(x, ry, rxT)


# --------------------------------------------------------------------------
# FineModule.forward
# --------------------------------------------------------------------------
def fine_module_forward(image, params, *, low_size=32, step_size=32,
                        use_bf16=True, vmem_budget_bytes=None):
    """image: (3, H, W) float32 in [0, 1] (PIL image after ToTensor, CHW)."""
    C, H, W = image.shape
    assert C == 3
    orig_h, orig_w = H, W          # PIL image.size == (W, H) == tensor size

    n_y = round(H / step_size)
    n_x = round(W / step_size)
    assert n_y * step_size == H and n_x * step_size == W, \
        "H/W must be multiples of step_size"
    covered_h = min(H - 1, n_y * step_size)    # reference truncates to h-1 / w-1
    covered_w = min(W - 1, n_x * step_size)
    tail_rows = H - covered_h                  # == 1 here (last row never covered)

    cd = jnp.bfloat16 if use_bf16 else jnp.float32
    cdb = jnp.dtype(cd).itemsize
    budget = int(vmem_budget_bytes) if vmem_budget_bytes else _default_vmem_budget()
    vmem_limit = int(min(max(32 << 20, 2 * budget), 112 << 20))

    # torchvision Resize(int): shorter edge -> low_size, aspect preserved.
    if H <= W:
        low_h, low_w = low_size, max(1, int(low_size * W / H))
    else:
        low_h, low_w = max(1, int(low_size * H / W)), low_size

    mean = jnp.asarray(MEAN, jnp.float32)
    std = jnp.asarray(STD, jnp.float32)
    lw, lb = params["low_w"], params["low_b"]
    hw, hb = params["high_w"], params["high_b"]

    # Fold ImageNet normalize into the low head (exact affine fold).
    w_lo = lw / std
    b_lo = lb[0] - jnp.sum(lw * mean / std)
    # Fold ImageNet normalize (image channels) + TF.normalize((0.5,),(0.5,))
    # (coarse-mask channel) into the high head (exact affine fold).
    w_hi = hw[:3] / std
    w_hm = 2.0 * hw[3]
    b_hi = hb[0] - jnp.sum(hw[:3] * mean / std) - hw[3]
    p = jnp.concatenate([w_lo, b_lo[None], w_hi, b_hi[None]]).astype(jnp.float32)  # (8,)

    # Resize matrices: down to (low_h, low_w), up to (H, W).  w_hm folded into uxT.
    wy = _bilinear_weight_matrix(low_h, H).astype(cd)                   # (low_h, H)
    wxT = _bilinear_weight_matrix(low_w, W).T.astype(cd)                # (W, low_w)
    uy = _bilinear_weight_matrix(H, low_h).astype(cd)                   # (H, low_h)
    uxT = (w_hm * _bilinear_weight_matrix(W, low_w).T).astype(cd)       # (low_w, W)

    # Uncovered last column (reference's min(w-1, ...) truncation) -> lane mask.
    cmask = (jnp.arange(W) < covered_w).astype(jnp.float32).reshape(1, W)

    fused_bytes = (4 * H * W * 4 + (wy.size + wxT.size + uy.size + uxT.size) * cdb
                   + W * 4)
    if fused_bytes <= min(budget, 4 << 20):
        # Small image: single pallas_call, no HBM intermediates at all.
        fine = _fused_forward(image, wy, wxT, uy, uxT, p, cmask,
                              tail_rows=tail_rows, vmem_limit=vmem_limit)
    else:
        # ---- pass 1: tiled low-branch downsample + xc_hi stash ----
        resident1 = low_h * W * 4 + 2 * (wxT.size + uxT.size + low_h * W) * cdb + (1 << 14)
        per_row1 = 2 * (3 * W * 4 + low_h * cdb + W * 4)     # image + wy + xc_hi, 2x-buffered
        rows1 = _largest_band(H, max(128, (budget - resident1) // per_row1), align=128)
        xchi, mu = _low_prep(image, wy, wxT, uxT, p, rows=rows1, out_dtype=cd,
                             vmem_limit=vmem_limit)

        # ---- pass 2: banded upsample + high head (coarse stays in VMEM) ----
        resident2 = 2 * mu.size * cdb + 2 * W * 4 + (1 << 14)
        per_row2 = 2 * (2 * W * 4 + low_h * cdb)             # xc_hi + out + uy, 2x-buffered
        cap = H if H <= 512 else max(8, H // 2)               # keep >=2 bands for megacore
        rows2 = _largest_band(H, min(cap, max(8, (budget - resident2) // per_row2)), align=8)
        fine = _fine_bands(xchi, mu, uy, cmask, rows=rows2, tail_rows=tail_rows,
                           vmem_limit=vmem_limit)

    # ---- final resize back to original size (identity here -> skipped) ----
    if (orig_h, orig_w) != (H, W):
        fine = bilinear_resize_1ch(fine, orig_h, orig_w)
    return fine


# --------------------------------------------------------------------------
# Pure-JAX reference (same math, f32) for correctness checking.
# --------------------------------------------------------------------------
def fine_module_reference(image, params, *, low_size=32, step_size=32):
    C, H, W = image.shape
    mean = jnp.asarray(MEAN, jnp.float32).reshape(3, 1, 1)
    std = jnp.asarray(STD, jnp.float32).reshape(3, 1, 1)
    if H <= W:
        low_h, low_w = low_size, max(1, int(low_size * W / H))
    else:
        low_h, low_w = max(1, int(low_size * H / W)), low_size
    wy = _bilinear_weight_matrix(low_h, H)
    wx = _bilinear_weight_matrix(low_w, W)
    uy = _bilinear_weight_matrix(H, low_h)
    ux = _bilinear_weight_matrix(W, low_w)

    low_img = jnp.einsum("ah,chw,bw->cab", wy, image, wx)
    low_img = (low_img - mean) / std
    z = jnp.tensordot(params["low_w"], low_img, axes=1) + params["low_b"][0]
    m = jax.nn.sigmoid(z)                                    # (low_h, low_w)
    coarse = uy @ m @ ux.T                                    # (H, W)
    coarse = 2.0 * coarse - 1.0                               # TF.normalize((0.5,), (0.5,))
    img_n = (image - mean) / std
    zh = (jnp.tensordot(params["high_w"][:3], img_n, axes=1)
          + params["high_w"][3] * coarse + params["high_b"][0])
    fine = jax.nn.sigmoid(zh)
    n_y, n_x = round(H / step_size), round(W / step_size)
    ch = min(H - 1, n_y * step_size)
    cw = min(W - 1, n_x * step_size)
    mask = (jnp.arange(H)[:, None] < ch) & (jnp.arange(W)[None, :] < cw)
    return jnp.where(mask, fine, 0.0)[None]


if __name__ == "__main__":
    key = jax.random.PRNGKey(0)
    k_img1, k_img2, k_low, k_high = jax.random.split(key, 4)

    params = {
        "low_w": (0.5 * jax.random.normal(k_low, (3,))).astype(jnp.float32),
        "low_b": jnp.asarray([0.1], jnp.float32),
        "high_w": (0.5 * jax.random.normal(k_high, (4,))).astype(jnp.float32),
        "high_b": jnp.asarray([-0.05], jnp.float32),
    }

    # Case 1: 128x128 -> fully fused single pallas_call path.
    img1 = jax.random.uniform(k_img1, (3, 128, 128), dtype=jnp.float32)
    fwd1 = jax.jit(functools.partial(fine_module_forward, low_size=32, step_size=32))
    out1 = jax.block_until_ready(fwd1(img1, params))
    assert out1.shape == (1, 128, 128), out1.shape
    assert bool(jnp.all(jnp.isfinite(out1)))
    ref1 = fine_module_reference(img1, params, low_size=32, step_size=32)
    err1 = float(jnp.max(jnp.abs(out1 - ref1)))
    assert err1 < 5e-2, f"case1 max err {err1}"

    # Case 2: 512x256 with a tiny VMEM budget -> tiled low branch + banded kernel.
    img2 = jax.random.uniform(k_img2, (3, 512, 256), dtype=jnp.float32)
    fwd2 = jax.jit(functools.partial(fine_module_forward, low_size=32, step_size=32,
                                     vmem_budget_bytes=1 << 20))
    out2 = jax.block_until_ready(fwd2(img2, params))
    assert out2.shape == (1, 512, 256), out2.shape
    assert bool(jnp.all(jnp.isfinite(out2)))
    ref2 = fine_module_reference(img2, params, low_size=32, step_size=32)
    err2 = float(jnp.max(jnp.abs(out2 - ref2)))
    assert err2 < 5e-2, f"case2 max err {err2}"

    print("KERNEL_OK")
</pallas_src>

<mosaic_0001>
module attributes {stable_mosaic.version = 11 : i64} {
  func.func @_fused_kernel(%arg0: memref<3x128x128xf32, #tpu.memory_space<vmem>>, %arg1: memref<32x128xbf16, #tpu.memory_space<vmem>>, %arg2: memref<128x32xbf16, #tpu.memory_space<vmem>>, %arg3: memref<128x32xbf16, #tpu.memory_space<vmem>>, %arg4: memref<32x128xbf16, #tpu.memory_space<vmem>>, %arg5: memref<8xf32, #tpu.memory_space<smem>>, %arg6: memref<1x128xf32, #tpu.memory_space<vmem>>, %arg7: memref<1x128x128xf32, #tpu.memory_space<vmem>>) attributes {dimension_semantics = [], scalar_prefetch = 0 : i64, scratch_operands = 0 : i64, tpu.core_type = #tpu.core_type<tc>} {
    %c0 = arith.constant 0 : index
    %c0_0 = arith.constant 0 : index
    %c0_1 = arith.constant 0 : index
    %0 = vector.load %arg0[%c0, %c0_0, %c0_1] : memref<3x128x128xf32, #tpu.memory_space<vmem>>, vector<1x128x128xf32>
    %1 = vector.shape_cast %0 : vector<1x128x128xf32> to vector<128x128xf32>
    %c1 = arith.constant 1 : index
    %c0_2 = arith.constant 0 : index
    %c0_3 = arith.constant 0 : index
    %2 = vector.load %arg0[%c1, %c0_2, %c0_3] : memref<3x128x128xf32, #tpu.memory_space<vmem>>, vector<1x128x128xf32>
    %3 = vector.shape_cast %2 : vector<1x128x128xf32> to vector<128x128xf32>
    %c2 = arith.constant 2 : index
    %c0_4 = arith.constant 0 : index
    %c0_5 = arith.constant 0 : index
    %4 = vector.load %arg0[%c2, %c0_4, %c0_5] : memref<3x128x128xf32, #tpu.memory_space<vmem>>, vector<1x128x128xf32>
    %5 = vector.shape_cast %4 : vector<1x128x128xf32> to vector<128x128xf32>
    %c0_6 = arith.constant 0 : index
    %6 = memref.load %arg5[%c0_6] : memref<8xf32, #tpu.memory_space<smem>>
    %7 = vector.broadcast %6 : f32 to vector<128x128xf32>
    %8 = arith.mulf %7, %1 : vector<128x128xf32>
    %c1_7 = arith.constant 1 : index
    %9 = memref.load %arg5[%c1_7] : memref<8xf32, #tpu.memory_space<smem>>
    %10 = vector.broadcast %9 : f32 to vector<128x128xf32>
    %11 = arith.mulf %10, %3 : vector<128x128xf32>
    %12 = arith.addf %8, %11 : vector<128x128xf32>
    %c2_8 = arith.constant 2 : index
    %13 = memref.load %arg5[%c2_8] : memref<8xf32, #tpu.memory_space<smem>>
    %14 = vector.broadcast %13 : f32 to vector<128x128xf32>
    %15 = arith.mulf %14, %5 : vector<128x128xf32>
    %16 = arith.addf %12, %15 : vector<128x128xf32>
    %17 = arith.truncf %16 : vector<128x128xf32> to vector<128x128xbf16>
    %c0_9 = arith.constant 0 : index
    %c0_10 = arith.constant 0 : index
    %18 = vector.load %arg1[%c0_9, %c0_10] : memref<32x128xbf16, #tpu.memory_space<vmem>>, vector<32x128xbf16>
    %cst = arith.constant dense<0.000000e+00> : vector<32x128xf32>
    %19 = tpu.matmul %18, %17, %cst {dimension_numbers = #tpu.dot_dimension_numbers<[1], [0], [0], [1], [0, 0, 1, 1], [], []>} : vector<32x128xbf16>, vector<128x128xbf16>, vector<32x128xf32> -> vector<32x128xf32>
    %20 = arith.truncf %19 : vector<32x128xf32> to vector<32x128xbf16>
    %c0_11 = arith.constant 0 : index
    %c0_12 = arith.constant 0 : index
    %21 = vector.load %arg2[%c0_11, %c0_12] : memref<128x32xbf16, #tpu.memory_space<vmem>>, vector<128x32xbf16>
    %cst_13 = arith.constant dense<0.000000e+00> : vector<32x32xf32>
    %22 = tpu.matmul %20, %21, %cst_13 {dimension_numbers = #tpu.dot_dimension_numbers<[1], [0], [0], [1], [0, 0, 1, 1], [], []>} : vector<32x128xbf16>, vector<128x32xbf16>, vector<32x32xf32> -> vector<32x32xf32>
    %c3 = arith.constant 3 : index
    %23 = memref.load %arg5[%c3] : memref<8xf32, #tpu.memory_space<smem>>
    %24 = vector.broadcast %23 : f32 to vector<32x32xf32>
    %25 = arith.addf %22, %24 : vector<32x32xf32>
    %26 = arith.negf %25 : vector<32x32xf32>
    %27 = math.exp %26 : vector<32x32xf32>
    %cst_14 = arith.constant 1.000000e+00 : f32
    %28 = vector.broadcast %cst_14 : f32 to vector<32x32xf32>
    %29 = arith.addf %28, %27 : vector<32x32xf32>
    %30 = arith.divf %28, %29 : vector<32x32xf32>
    %31 = arith.truncf %30 : vector<32x32xf32> to vector<32x32xbf16>
    %c0_15 = arith.constant 0 : index
    %c0_16 = arith.constant 0 : index
    %32 = vector.load %arg4[%c0_15, %c0_16] : memref<32x128xbf16, #tpu.memory_space<vmem>>, vector<32x128xbf16>
    %cst_17 = arith.constant dense<0.000000e+00> : vector<32x128xf32>
    %33 = tpu.matmul %31, %32, %cst_17 {dimension_numbers = #tpu.dot_dimension_numbers<[1], [0], [0], [1], [0, 0, 1, 1], [], []>} : vector<32x32xbf16>, vector<32x128xbf16>, vector<32x128xf32> -> vector<32x128xf32>
    %c0_18 = arith.constant 0 : index
    %c0_19 = arith.constant 0 : index
    %34 = vector.load %arg3[%c0_18, %c0_19] : memref<128x32xbf16, #tpu.memory_space<vmem>>, vector<128x32xbf16>
    %35 = arith.truncf %33 : vector<32x128xf32> to vector<32x128xbf16>
    %cst_20 = arith.constant dense<0.000000e+00> : vector<128x128xf32>
    %36 = tpu.matmul %34, %35, %cst_20 {dimension_numbers = #tpu.dot_dimension_numbers<[1], [0], [0], [1], [0, 0, 1, 1], [], []>} : vector<128x32xbf16>, vector<32x128xbf16>, vector<128x128xf32> -> vector<128x128xf32>
    %c4 = arith.constant 4 : index
    %37 = memref.load %arg5[%c4] : memref<8xf32, #tpu.memory_space<smem>>
    %38 = vector.broadcast %37 : f32 to vector<128x128xf32>
    %39 = arith.mulf %38, %1 : vector<128x128xf32>
    %c5 = arith.constant 5 : index
    %40 = memref.load %arg5[%c5] : memref<8xf32, #tpu.memory_space<smem>>
    %41 = vector.broadcast %40 : f32 to vector<128x128xf32>
    %42 = arith.mulf %41, %3 : vector<128x128xf32>
    %43 = arith.addf %39, %42 : vector<128x128xf32>
    %c6 = arith.constant 6 : index
    %44 = memref.load %arg5[%c6] : memref<8xf32, #tpu.memory_space<smem>>
    %45 = vector.broadcast %44 : f32 to vector<128x128xf32>
    %46 = arith.mulf %45, %5 : vector<128x128xf32>
    %47 = arith.addf %43, %46 : vector<128x128xf32>
    %c7 = arith.constant 7 : index
    %48 = memref.load %arg5[%c7] : memref<8xf32, #tpu.memory_space<smem>>
    %49 = vector.broadcast %48 : f32 to vector<128x128xf32>
    %50 = arith.addf %47, %49 : vector<128x128xf32>
    %51 = arith.addf %50, %36 : vector<128x128xf32>
    %52 = arith.negf %51 : vector<128x128xf32>
    %53 = math.exp %52 : vector<128x128xf32>
    %cst_21 = arith.constant 1.000000e+00 : f32
    %54 = vector.broadcast %cst_21 : f32 to vector<128x128xf32>
    %55 = arith.addf %54, %53 : vector<128x128xf32>
    %56 = arith.divf %54, %55 : vector<128x128xf32>
    %c0_22 = arith.constant 0 : index
    %c0_23 = arith.constant 0 : index
    %57 = vector.load %arg6[%c0_22, %c0_23] : memref<1x128xf32, #tpu.memory_space<vmem>>, vector<1x128xf32>
    %58 = vector.broadcast %57 : vector<1x128xf32> to vector<128x128xf32>
    %59 = arith.mulf %56, %58 : vector<128x128xf32>
    %c0_24 = arith.constant 0 : index
    %c0_25 = arith.constant 0 : index
    %c0_26 = arith.constant 0 : index
    %60 = vector.load %arg7[%c0_24, %c0_25, %c0_26] : memref<1x128x128xf32, #tpu.memory_space<vmem>>, vector<1x128x128xf32>
    %61 = vector.shape_cast %60 : vector<1x128x128xf32> to vector<128x128xf32>
    %62 = vector.shape_cast %59 : vector<128x128xf32> to vector<1x128x128xf32>
    tpu.vector_store %arg7[%c0_24, %c0_25, %c0_26], %62 {strides = array<i32>} : memref<1x128x128xf32, #tpu.memory_space<vmem>>, vector<1x128x128xf32>,
    %cst_27 = arith.constant 0.000000e+00 : f32
    %63 = vector.broadcast %cst_27 : f32 to vector<1x1x128xf32>
    %c0_28 = arith.constant 0 : index
    %c127 = arith.constant 127 : index
    %c0_29 = arith.constant 0 : index
    %64 = vector.load %arg7[%c0_28, %c127, %c0_29] : memref<1x128x128xf32, #tpu.memory_space<vmem>>, vector<1x1x128xf32>
    tpu.vector_store %arg7[%c0_28, %c127, %c0_29], %63 {strides = array<i32>} : memref<1x128x128xf32, #tpu.memory_space<vmem>>, vector<1x1x128xf32>,
    return
  }
}

</mosaic_0001>

<bundles_post_ra>
// kernel: fine_module_forward.1
= control target key start
LH: loop header
LB: loop body
LE: loop exit
PB: predicated region body
PF: predicated region fallthrough
CT: control target
= control target key end

     0   :  { %12 = vsyncpa [#allocation3], 0  ;;  %s1752_s0 = inlined_call_operand.hbm [shape: f32[3,128,128], index: 0, kind: input, shape index: {}]   ;;  %s1753_s1 = inlined_call_operand.vmem [shape: bf16[32,128], index: 1, kind: input, shape index: {}]   ;;  %s1754_s2 = inlined_call_operand.vmem [shape: bf16[128,32], index: 2, kind: input, shape index: {}]   ;;  %s1755_s3 = inlined_call_operand.vmem [shape: bf16[128,32], index: 3, kind: input, shape index: {}]   ;;  %s1756_s4 = inlined_call_operand.vmem [shape: bf16[32,128], index: 4, kind: input, shape index: {}]   ;;  %s1757_s5 = inlined_call_operand.vmem [shape: f32[8], index: 5, kind: input, shape index: {}]   ;;  %s1758_s6 = inlined_call_operand.vmem [shape: f32[1,128], index: 6, kind: input, shape index: {}]   ;;  %s1759_s7 = inlined_call_operand.hbm [shape: f32[1,128,128], index: 7, kind: output, shape index: {}]  }
   0x1   :  { %13 = vsyncpa [#allocation5], 0 }
   0x2   :  { %14 = vsyncpa [#allocation4], 0  ;;  %s1264_s24 = smov [#allocation2]   ;;  %s41_s28 = sshll.u32 %s1757_s5, 4  ;;  %s42_s28 = int_to_ptr.vmem [resolvable:$true] %s41_s28 }
   0x3   :  { %s20_s25 = sshll.u32 %s1264_s24, 4  ;;  %s1202_s8 = scalar_lea.hbm %s1752_s0, 6144  ;;  %s21_s25 = int_to_ptr.vmem [resolvable:$true] %s20_s25 }
   0x4   :  { %p1203_p0 = scmp.ne.s32.totalorder %s1752_s0, %s1202_s8  ;;  %p1206_p1 = scmp.lt.u32.totalorder %s1202_s8, %s1752_s0 }
   0x6   :  { %p1208_p2 = pnand %p1206_p1, %p1203_p0 }
   0x8   :  { %1211 = shalt.err (!%p1208_p2)
}
   0x9   :  { %s1212_s13 = scalar_lea.vmem %s21_s25, 6144  ;;  %p1217_p4 = scmp.lt.s32.totalorder %s21_s25, %s21_s25 }
   0xa   :  { %p1213_p3 = scmp.ne.s32.totalorder %s21_s25, %s1212_s13  ;;  %p1218_p5 = scmp.lt.s32.totalorder %s1212_s13, %s1212_s13 }
   0xc   :  { %p1219_p6 = por %p1218_p5, %p1217_p4 }
   0xe   :  { %p1220_p7 = pnand %p1219_p6, %p1213_p3 }
  0x10   :  { %1223 = shalt.err (!%p1220_p7)
}
  0x11   :  { %s1265_s5 = smov 128   ;;  %s1266_s14 = smov 8  }
  0x12   :  { %26 = dma.hbm_to_vmem [thread:$0]  %s1752_s0, 6144, %s21_s25, [#allocation3], %s1265_s5, %s1265_s5, %s1266_s14  }
  0x13   :  { %s1224_s17 = scalar_lea.vmem %s42_s28, 16  ;;  %p1229_p9 = scmp.lt.s32.totalorder %s42_s28, %s42_s28 }
  0x14   :  { %p1225_p8 = scmp.ne.s32.totalorder %s42_s28, %s1224_s17  ;;  %p1230_p10 = scmp.lt.s32.totalorder %s1224_s17, %s1224_s17 }
  0x16   :  { %p1231_p11 = por %p1230_p10, %p1229_p9 }
  0x18   :  { %p1232_p12 = pnand %p1231_p11, %p1225_p8 }
  0x1a   :  { %1235 = shalt.err (!%p1232_p12)
}
  0x1b   :  { %s1267_s18 = smov [#allocation6]  }
  0x1c   :  { %44 = dma.vmem_to_smem %s42_s28, 16, %s1267_s18, [#allocation5]  }
  0x1d   :  { %1258 = dma.done.wait [#allocation3], 6144  }
  0x1e   :  { %1259 = vsyncadd [#allocation3], 4294961152 }
  0x1f   :  { %1260 = dma.done.wait [#allocation5], 16  }
  0x20   :  { %1261 = vsyncadd [#allocation5], 4294967280 }
  0x21   :  { %53 = sfence }
  0x22   :  { %s105_s19 = sld [smem:[#allocation6]]  ;;  %s932_s20 = sld [smem:[#allocation6 + $0x1]]  ;;  %v1328_v0 = vld [vmem:[#allocation2] sm:$0xff]  ;;  %v1330_v1 = vld [vmem:[#allocation2 + $0x8] sm:$0xff]  ;;  %v1334_v3 = vld [vmem:[#allocation2 + $0x10] sm:$0xff]  ;;  %vm423_vm0 = vcmask 261120  }
  0x23   :  { %s933_s21 = sld [smem:[#allocation6 + $0x2]]  ;;  %v1332_v2 = vld [vmem:[#allocation2 + $0x80] sm:$0xff]  ;;  %v1336_v4 = vld [vmem:[#allocation2 + $0x88] sm:$0xff]  ;;  %v1340_v6 = vld [vmem:[#allocation2 + $0x18] sm:$0xff]  ;;  %s969_s13 = sld [smem:[#allocation6 + $0x4]] }
  0x24   :  { %v1338_v5 = vld [vmem:[#allocation2 + $0x100] sm:$0xff]  ;;  %v1342_v7 = vld [vmem:[#allocation2 + $0x108] sm:$0xff]  ;;  %v1346_v9 = vld [vmem:[#allocation2 + $0x90] sm:$0xff]  ;;  %s970_s15 = sld [smem:[#allocation6 + $0x5]]  ;;  %s971_s16 = sld [smem:[#allocation6 + $0x6]] }
  0x25   :  { %1768 = vst [vmem:[#allocation11_spill] sm:$0xff] %v1342_v7  ;;  %v1348_v10 = vld [vmem:[#allocation2 + $0x98] sm:$0xff]  ;;  %v1356_v14 = vld [vmem:[#allocation2 + $0x110] sm:$0xff]  ;;  %v1370_v21 = vld [vmem:[#allocation2 + $0x20] sm:$0xff] }
  0x26   :  { %v1358_v15 = vld [vmem:[#allocation2 + $0x118] sm:$0xff]  ;;  %v1372_v22 = vld [vmem:[#allocation2 + $0x28] sm:$0xff]  ;;  %v1382_v27 = vld [vmem:[#allocation2 + $0xa0] sm:$0xff] }
  0x27   :  { %v1384_v28 = vld [vmem:[#allocation2 + $0xa8] sm:$0xff]  ;;  %v1390_v33 = vld [vmem:[#allocation2 + $0x120] sm:$0xff]  ;;  %v1398_v39 = vld [vmem:[#allocation2 + $0x30] sm:$0xff] }
  0x28   :  { %v1344_v8 = vstv %s105_s19  ;;  %v1354_v13 = vstv %s932_s20  ;;  %v1392_v34 = vld [vmem:[#allocation2 + $0x128] sm:$0xff]  ;;  %v1400_v40 = vld [vmem:[#allocation2 + $0x38] sm:$0xff]  ;;  %v1402_v41 = vld [vmem:[#allocation2 + $0xb0] sm:$0xff] }
  0x29   :  { %v107_v11 = vmul.f32 %v1344_v8, %v1328_v0  ;;  %v108_v12 = vmul.f32 %v1344_v8, %v1330_v1  ;;  %v109_v16 = vmul.f32 %v1344_v8, %v1334_v3  ;;  %v125_v17 = vmul.f32 %v1354_v13, %v1332_v2  ;;  %v1408_v46 = vld [vmem:[#allocation2 + $0xb8] sm:$0xff]  ;;  %v1410_v47 = vld [vmem:[#allocation2 + $0x130] sm:$0xff]  ;;  %v1418_v53 = vld [vmem:[#allocation2 + $0x40] sm:$0xff] }
  0x2a   :  { %v126_v18 = vmul.f32 %v1354_v13, %v1336_v4  ;;  %v1366_v19 = vstv %s933_s21  ;;  %v110_v20 = vmul.f32 %v1344_v8, %v1340_v6  ;;  %v127_v25 = vmul.f32 %v1354_v13, %v1346_v9  ;;  %v1412_v48 = vld [vmem:[#allocation2 + $0x138] sm:$0xff]  ;;  %v1420_v54 = vld [vmem:[#allocation2 + $0x48] sm:$0xff]  ;;  %v1422_v55 = vld [vmem:[#allocation2 + $0xc0] sm:$0xff] }
  0x2b   :  { %v159_v23 = vmul.f32 %v1366_v19, %v1338_v5  ;;  %v160_v24 = vmul.f32 %v1366_v19, %v1342_v7  ;;  %v128_v26 = vmul.f32 %v1354_v13, %v1348_v10  ;;  %v141_v29 = vadd.f32 %v125_v17, %v107_v11  ;;  %1769 = vst [vmem:[#allocation12_spill] sm:$0xff] %v1420_v54  ;;  %v1426_v60 = vld [vmem:[#allocation2 + $0xc8] sm:$0xff]  ;;  %v1428_v61 = vld [vmem:[#allocation2 + $0x140] sm:$0xff]  ;;  %v1438_v17 = vld [vmem:[#allocation2 + $0x50] sm:$0xff] }
  0x2c   :  { %v142_v30 = vadd.f32 %v126_v18, %v108_v12  ;;  %v161_v31 = vmul.f32 %v1366_v19, %v1356_v14  ;;  %v162_v32 = vmul.f32 %v1366_v19, %v1358_v15  ;;  %v143_v35 = vadd.f32 %v127_v25, %v109_v16  ;;  %1770 = vst [vmem:[#allocation13_spill] sm:$0xff] %v1426_v60  ;;  %v1430_v62 = vld [vmem:[#allocation2 + $0x148] sm:$0xff]  ;;  %v1440_v18 = vld [vmem:[#allocation2 + $0x58] sm:$0xff] }
  0x2d   :  { %v144_v36 = vadd.f32 %v128_v26, %v110_v20  ;;  %v111_v37 = vmul.f32 %v1344_v8, %v1370_v21  ;;  %v112_v38 = vmul.f32 %v1344_v8, %v1372_v22  ;;  %v175_v42 = vadd.f32 %v159_v23, %v141_v29  ;;  %1771 = vst [vmem:[#allocation14_spill] sm:$0xff] %v1428_v61  ;;  %v1442_v20 = vld [vmem:[#allocation2 + $0xd0] sm:$0xff]  ;;  %v1448_v29 = vld [vmem:[#allocation2 + $0xd8] sm:$0xff] }
  0x2e   :  { %v176_v43 = vadd.f32 %v160_v24, %v142_v30  ;;  %v129_v44 = vmul.f32 %v1354_v13, %v1382_v27  ;;  %v130_v45 = vmul.f32 %v1354_v13, %v1384_v28  ;;  %v177_v49 = vadd.f32 %v161_v31, %v143_v35  ;;  %1772 = vst [vmem:[#allocation15_spill] sm:$0xff] %v1430_v62  ;;  %v1450_v30 = vld [vmem:[#allocation2 + $0x150] sm:$0xff]  ;;  %v1452_v31 = vld [vmem:[#allocation2 + $0x158] sm:$0xff] }
  0x2f   :  { %v178_v50 = vadd.f32 %v162_v32, %v144_v36  ;;  %v163_v51 = vmul.f32 %v1366_v19, %v1390_v33  ;;  %v164_v52 = vmul.f32 %v1366_v19, %v1392_v34  ;;  %v113_v59 = vmul.f32 %v1344_v8, %v1398_v39  ;;  %1773 = vst [vmem:[#allocation16_spill] sm:$0xff] %v1450_v30  ;;  %v1102_v32 = vld [vmem:[%s1753_s1] sm:$0xff]  }
  0x30   :  { %v191_v56 = vpack.c.bf16 %v176_v43, %v175_v42  ;;  %v145_v57 = vadd.f32 %v129_v44, %v111_v37  ;;  %v146_v58 = vadd.f32 %v130_v45, %v112_v38  ;;  %v114_v11 = vmul.f32 %v1344_v8, %v1400_v40  ;;  %1774 = vst [vmem:[#allocation17_spill] sm:$0xff] %v1452_v31  ;;  %v1461_v42 = vld [vmem:[#allocation2 + $0x60] sm:$0xff] }
  0x31   :  { %v192_v63 = vpack.c.bf16 %v178_v50, %v177_v49  ;;  %v131_v12 = vmul.f32 %v1354_v13, %v1402_v41  ;;  %v132_v16 = vmul.f32 %v1354_v13, %v1408_v46  ;;  %v165_v25 = vmul.f32 %v1366_v19, %v1410_v47  ;;  %v1469_v50 = vld [vmem:[#allocation2 + $0x68] sm:$0xff]  ;;  %1040 = vmatprep.mubr.bf16.mxu0 %v1102_v32 }
  0x32   :  { %1024 = vmatprep.subr.bf16.mxu0 %v191_v56  ;;  %v179_v23 = vadd.f32 %v163_v51, %v145_v57  ;;  %v180_v24 = vadd.f32 %v164_v52, %v146_v58  ;;  %v166_v26 = vmul.f32 %v1366_v19, %v1412_v48  ;;  %v115_v37 = vmul.f32 %v1344_v8, %v1418_v53  ;;  %v1471_v51 = vld [vmem:[#allocation2 + $0xe0] sm:$0xff]  ;;  %v1473_v52 = vld [vmem:[#allocation2 + $0xe8] sm:$0xff] }
  0x33   :  { %1025 = vmatpush3.bf16.msra.mxu0 %v191_v56  ;;  %v147_v35 = vadd.f32 %v131_v12, %v113_v59  ;;  %v148_v36 = vadd.f32 %v132_v16, %v114_v11  ;;  %v116_v38 = vmul.f32 %v1344_v8, %v1420_v54  ;;  %v133_v44 = vmul.f32 %v1354_v13, %v1422_v55  ;;  %v1104_v56 = vld [vmem:[%s1754_s2] sm:$0xff]   ;;  %v1488_v54 = vld [vmem:[#allocation2 + $0x168] sm:$0xff] }
  0x34   :  { %1026 = vmatprep.subr.bf16.mxu0 %v192_v63  ;;  %v193_v43 = vpack.c.bf16 %v180_v24, %v179_v23  ;;  %v134_v45 = vmul.f32 %v1354_v13, %v1426_v60  ;;  %v167_v49 = vmul.f32 %v1366_v19, %v1428_v61  ;;  %1775 = vst [vmem:[#allocation18_spill] sm:$0xff] %v1473_v52  ;;  %v1482_v12 = vld [vmem:[#allocation2 + $0x160] sm:$0xff] }
  0x35   :  { %v181_v57 = vadd.f32 %v165_v25, %v147_v35  ;;  %v182_v58 = vadd.f32 %v166_v26, %v148_v36  ;;  %v168_v59 = vmul.f32 %v1366_v19, %v1430_v62  ;;  %v117_v11 = vmul.f32 %v1344_v8, %v1438_v17  ;;  %1044 = vmatprep.subr.bf16.mxu1 %v1104_v56  ;;  %v1105_v25 = vld [vmem:[%s1754_s2 + $0x8] sm:$0xff]  }
  0x36   :  { %v149_v16 = vadd.f32 %v133_v44, %v115_v37  ;;  %v150_v23 = vadd.f32 %v134_v45, %v116_v38  ;;  %v118_v24 = vmul.f32 %v1344_v8, %v1440_v18  ;;  %v135_v60 = vmul.f32 %v1354_v13, %v1442_v20  ;;  %v1499_v37 = vld [vmem:[#allocation2 + $0x70] sm:$0xff]  ;;  %v1501_v38 = vld [vmem:[#allocation2 + $0x78] sm:$0xff]  ;;  %1045 = vmatpush3.bf16.msra.mxu1 %v1104_v56 }
  0x37   :  { %1027 = vmatpush3.bf16.msra.mxu0 %v192_v63  ;;  %v194_v26 = vpack.c.bf16 %v182_v58, %v181_v57  ;;  %v136_v32 = vmul.f32 %v1354_v13, %v1448_v29  ;;  %v169_v35 = vmul.f32 %v1366_v19, %v1450_v30  ;;  %v170_v36 = vmul.f32 %v1366_v19, %v1452_v31  ;;  %v1505_v57 = vld [vmem:[#allocation2 + $0xf0] sm:$0xff]  ;;  %v1513_v30 = vld [vmem:[#allocation2 + $0xf8] sm:$0xff] }
  0x38   :  { %1028 = vmatprep.subr.bf16.mxu0 %v193_v43  ;;  %v183_v44 = vadd.f32 %v167_v49, %v149_v16  ;;  %v184_v45 = vadd.f32 %v168_v59, %v150_v23  ;;  %v151_v62 = vadd.f32 %v135_v60, %v117_v11  ;;  %v119_v63 = vmul.f32 %v1344_v8, %v1461_v42  ;;  %v1517_v11 = vld [vmem:[#allocation2 + $0x170] sm:$0xff]  ;;  %v1524_v56 = vld [vmem:[#allocation2 + $0x178] sm:$0xff] }
  0x39   :  { %v152_v58 = vadd.f32 %v136_v32, %v118_v24  ;;  %v120_v61 = vmul.f32 %v1344_v8, %v1469_v50  ;;  %v137_v31 = vmul.f32 %v1354_v13, %v1471_v51  ;;  %v138_v7 = vmul.f32 %v1354_v13, %v1473_v52  ;;  %1046 = vmatprep.subr.bf16.mxu1 %v1105_v25  ;;  %v1106_v16 = vld [vmem:[%s1754_s2 + $0x10] sm:$0xff]  }
  0x3a   :  { %v195_v49 = vpack.c.bf16 %v184_v45, %v183_v44  ;;  %v185_v60 = vadd.f32 %v169_v35, %v151_v62  ;;  %v171_v59 = vmul.f32 %v1366_v19, %v1482_v12  ;;  %v172_v52 = vmul.f32 %v1366_v19, %v1488_v54  ;;  %1047 = vmatpush3.bf16.msra.mxu1 %v1105_v25 }
  0x3b   :  { %1029 = vmatpush3.bf16.msra.mxu0 %v193_v43  ;;  %v186_v23 = vadd.f32 %v170_v36, %v152_v58  ;;  %v153_v24 = vadd.f32 %v137_v31, %v119_v63  ;;  %v154_v32 = vadd.f32 %v138_v7, %v120_v61  ;;  %v121_v62 = vmul.f32 %v1344_v8, %v1499_v37  ;;  %v1107_v7 = vld [vmem:[%s1754_s2 + $0x18] sm:$0xff]  }
  0x3c   :  { %1030 = vmatprep.subr.bf16.mxu0 %v194_v26  ;;  %v122_v35 = vmul.f32 %v1344_v8, %v1501_v38  ;;  %v139_v44 = vmul.f32 %v1354_v13, %v1505_v57  ;;  %v140_v43 = vmul.f32 %v1354_v13, %v1513_v30  ;;  %1048 = vmatprep.subr.bf16.mxu1 %v1106_v16  ;;  %v1108_v13 = vld [vmem:[%s1754_s2 + $0x20] sm:$0xff]  }
  0x3d   :  { %v196_v61 = vpack.c.bf16 %v186_v23, %v185_v60  ;;  %v187_v31 = vadd.f32 %v171_v59, %v153_v24  ;;  %v173_v36 = vmul.f32 %v1366_v19, %v1517_v11  ;;  %v188_v8 = vadd.f32 %v172_v52, %v154_v32  ;;  %v1109_v52 = vld [vmem:[%s1754_s2 + $0x28] sm:$0xff]   ;;  %v1110_v59 = vld [vmem:[%s1754_s2 + $0x30] sm:$0xff]  }
  0x3e   :  { %v155_v45 = vadd.f32 %v139_v44, %v121_v62  ;;  %v156_v63 = vadd.f32 %v140_v43, %v122_v35  ;;  %v174_v58 = vmul.f32 %v1366_v19, %v1524_v56  ;;  %1049 = vmatpush3.bf16.msra.mxu1 %v1106_v16  ;;  %v1111_v16 = vld [vmem:[%s1754_s2 + $0x38] sm:$0xff]   ;;  %v1112_v43 = vld [vmem:[%s1756_s4] sm:$0xff]   ;;  %s936_s2 = sld [smem:[#allocation6 + $0x3]] }
  0x3f   :  { %1031 = vmatpush3.bf16.msra.mxu0 %v194_v26  ;;  %1050 = vmatprep.subr.bf16.mxu1 %v1107_v7  ;;  %v197_v25 = vpack.c.bf16 %v188_v8, %v187_v31 }
  0x40   :  { %1032 = vmatprep.subr.bf16.mxu0 %v195_v49  ;;  %v189_v26 = vadd.f32 %v173_v36, %v155_v45  ;;  %v190_v60 = vadd.f32 %v174_v58, %v156_v63 }
  0x42   :  { %1051 = vmatpush3.bf16.msra.mxu1 %v1107_v7  ;;  %v198_v19 = vpack.c.bf16 %v190_v60, %v189_v26  ;;  %v1113_v7 = vld [vmem:[%s1756_s4 + $0x8] sm:$0xff]  }
  0x43   :  { %1033 = vmatpush3.bf16.msra.mxu0 %v195_v49  ;;  %1052 = vmatprep.subr.bf16.mxu1 %v1108_v13  ;;  %v1103_v49 = vld [vmem:[%s1753_s1 + $0x8] sm:$0xff]  }
  0x44   :  { %1034 = vmatprep.subr.bf16.mxu0 %v196_v61 }
  0x46   :  { %1053 = vmatpush3.bf16.msra.mxu1 %v1108_v13 }
  0x47   :  { %1035 = vmatpush3.bf16.msra.mxu0 %v196_v61  ;;  %1054 = vmatprep.subr.bf16.mxu1 %v1109_v52  ;;  %v283_v61 = vstv %s936_s2 }
  0x48   :  { %1036 = vmatprep.subr.bf16.mxu0 %v197_v25 }
  0x4a   :  { %1055 = vmatpush3.bf16.msra.mxu1 %v1109_v52 }
  0x4b   :  { %1037 = vmatpush3.bf16.msra.mxu0 %v197_v25  ;;  %1056 = vmatprep.subr.bf16.mxu1 %v1110_v59 }
  0x4c   :  { %1038 = vmatprep.subr.bf16.mxu0 %v198_v19 }
  0x4e   :  { %1057 = vmatpush3.bf16.msra.mxu1 %v1110_v59 }
  0x4f   :  { %1039 = vmatpush3.bf16.msra.mxu0 %v198_v19  ;;  %1058 = vmatprep.subr.bf16.mxu1 %v1111_v16 }
  0x50   :  { %1064 = vmatprep.subr.bf16.mxu0 %v1112_v43 }
  0x52   :  { %1041 = vmatmul.mubr.bf16.vlgmr.msra.gmra.mrb[0].mxu0 %v1103_v49  ;;  %1059 = vmatpush3.bf16.msra.mxu1 %v1111_v16 }
  0x53   :  { %1065 = vmatpush3.bf16.msra.mxu0 %v1112_v43 }
  0x54   :  { %1066 = vmatprep.subr.bf16.mxu0 %v1113_v7 }
  0x57   :  { %1067 = vmatpush3.bf16.msra.mxu0 %v1113_v7 }
 0x125   :  { %v1042_v23 = vpop.f32.mrb[0].mxu0 }
 0x126   :  { %v249_v24 = vpop.f32.mrb[1].mxu0 }
 0x127   :  { %v1043_v32 = vpop.f32.mrb[2].mxu0 }
 0x128   :  { %v265_v62 = vpack.c.bf16 %v1043_v32, %v1042_v23  ;;  %v252_v35 = vpop.f32.mrb[3].mxu0 }
 0x129   :  { %v264_v44 = vpack.c.bf16 %v252_v35, %v249_v24 }
 0x12b   :  { %1060 = vmatprep.mubr.bf16.mxu1 %v264_v44 }
 0x12c   :  { %1061 = vmatmul.mubr.bf16.vlgmr.msra.gmra.mrb[0].mxu1 %v265_v62 }
 0x1ff   :  { %v1062_v31 = vpop.f32.mrb[0].mxu1 }
 0x200   :  { %v375_v36 = vadd.f32 %v1062_v31, %v283_v61  ;;  %v366_v8 = vpop.f32.mrb[1].mxu1 }
 0x201   :  { %v367_v45 = vadd.f32 %v366_v8, %v283_v61  ;;  %v1063_v63 = vpop.f32.mrb[2].mxu1  ;;  %v1114_v8 = vld [vmem:[%s1755_s3 + $0x10] sm:$0xff]  }
 0x202   :  { %v947_v58 = vmul.f32 -1.442695, %v375_v36  ;;  %v378_v13 = vadd.f32 %v1063_v63, %v283_v61  ;;  %v369_v25 = vpop.f32.mrb[3].mxu1  ;;  %1080 = vmatprep.mubr.msk.bf16.mxu1 %vm423_vm0, %v1114_v8 }
 0x203   :  { %v945_v26 = vmul.f32 -1.442695, %v367_v45  ;;  %v370_v60 = vadd.f32 %v369_v25, %v283_v61  ;;  %v1118_v45 = vld [vmem:[%s1755_s3] sm:$0xff]  }
 0x204   :  { %1122 = vpow2.f32 %v947_v58  ;;  %v948_v52 = vmul.f32 -1.442695, %v378_v13 }
 0x205   :  { %1124 = vpow2.f32 %v945_v26  ;;  %v946_v19 = vmul.f32 -1.442695, %v370_v60 }
 0x206   :  { %1126 = vpow2.f32 %v948_v52  ;;  %v1115_v52 = vld [vmem:[%s1755_s3 + $0x18] sm:$0xff]  }
 0x207   :  { %1128 = vpow2.f32 %v946_v19  ;;  %v1119_v19 = vld [vmem:[%s1755_s3 + $0x8] sm:$0xff]  }
 0x20e   :  { %v1123_v59 = vpop.eup %1122 }
 0x20f   :  { %v1125_v49 = vpop.eup %1124  ;;  %v395_v16 = vadd.f32 1.0, %v1123_v59  ;;  %v1116_v59 = vld [vmem:[%s1755_s3 + $0x20] sm:$0xff]  }
 0x210   :  { %v1127_v23 = vpop.eup %1126  ;;  %v393_v24 = vadd.f32 1.0, %v1125_v49  ;;  %v1117_v49 = vld [vmem:[%s1755_s3 + $0x28] sm:$0xff]  }
 0x211   :  { %v1129_v32 = vpop.eup %1128  ;;  %1130 = vrcp.f32 %v395_v16  ;;  %v396_v62 = vadd.f32 1.0, %v1127_v23  ;;  %v1120_v16 = vld [vmem:[%s1755_s3 + $0x30] sm:$0xff]   ;;  %v1121_v23 = vld [vmem:[%s1755_s3 + $0x38] sm:$0xff]   ;;  %s972_s3 = sld [smem:[#allocation6 + $0x7]] }
 0x212   :  { %1132 = vrcp.f32 %v393_v24  ;;  %v394_v35 = vadd.f32 1.0, %v1129_v32  ;;  %v1596_v24 = vstv %s969_s13  ;;  %v1598_v32 = vstv %s970_s15 }
 0x213   :  { %1134 = vrcp.f32 %v396_v62  ;;  %v666_v62 = vmul.f32 %v1596_v24, %v1398_v39  ;;  %v685_v39 = vmul.f32 %v1598_v32, %v1408_v46  ;;  %v670_v46 = vmul.f32 %v1596_v24, %v1438_v17 }
 0x214   :  { %1136 = vrcp.f32 %v394_v35  ;;  %v684_v35 = vmul.f32 %v1598_v32, %v1402_v41  ;;  %v668_v17 = vmul.f32 %v1596_v24, %v1418_v53 }
 0x21b   :  { %v1131_v44 = vpop.eup %1130 }
 0x21c   :  { %v1133_v43 = vpop.eup %1132 }
 0x21d   :  { %v1135_v7 = vpop.eup %1134 }
 0x21e   :  { %v1137_v61 = vpop.eup %1136  ;;  %v406_v31 = vpack.c.bf16 %v1135_v7, %v1131_v44  ;;  %v1604_v44 = vstv %s971_s16  ;;  %v682_v7 = vmul.f32 %v1598_v32, %v1382_v27  ;;  %v683_v27 = vmul.f32 %v1598_v32, %v1384_v28 }
 0x21f   :  { %v405_v36 = vpack.c.bf16 %v1137_v61, %v1133_v43  ;;  %v664_v43 = vmul.f32 %v1596_v24, %v1370_v21  ;;  %v700_v61 = vadd.f32 %v684_v35, %v666_v62  ;;  %v716_v8 = vmul.f32 %v1604_v44, %v1390_v33  ;;  %v1779_v62 = vld [vmem:[#allocation12_spill] sm:$0xff]  ;;  %v1780_v35 = vld [vmem:[#allocation13_spill] sm:$0xff] }
 0x220   :  { %v665_v21 = vmul.f32 %v1596_v24, %v1372_v22  ;;  %v660_v33 = vmul.f32 %v1596_v24, %v1328_v0  ;;  %v678_v22 = vmul.f32 %v1598_v32, %v1332_v2  ;;  %v719_v28 = vmul.f32 %v1604_v44, %v1412_v48 }
 0x221   :  { %1068 = vmatprep.mubr.msk.bf16.mxu0 %vm423_vm0, %v405_v36  ;;  %v667_v36 = vmul.f32 %v1596_v24, %v1400_v40  ;;  %v698_v41 = vadd.f32 %v682_v7, %v664_v43  ;;  %v680_v40 = vmul.f32 %v1598_v32, %v1346_v9  ;;  %v681_v9 = vmul.f32 %v1598_v32, %v1348_v10 }
 0x222   :  { %1069 = vmatmul.mubr.msk.bf16.vlgmr.msra.gmra.mrb[4].mxu0 %vm423_vm0, %v406_v31  ;;  %v718_v31 = vmul.f32 %v1604_v44, %v1410_v47  ;;  %v662_v47 = vmul.f32 %v1596_v24, %v1334_v3  ;;  %v663_v3 = vmul.f32 %v1596_v24, %v1340_v6  ;;  %v661_v0 = vmul.f32 %v1596_v24, %v1330_v1 }
 0x223   :  { %1076 = vmatprep.mubr.msk.bf16.mxu0 %vm423_vm0, %v1118_v45  ;;  %v679_v2 = vmul.f32 %v1598_v32, %v1336_v4  ;;  %v699_v48 = vadd.f32 %v683_v27, %v665_v21  ;;  %v714_v6 = vmul.f32 %v1604_v44, %v1356_v14  ;;  %v717_v10 = vmul.f32 %v1604_v44, %v1392_v34 }
 0x224   :  { %v734_v45 = vadd.f32 %v718_v31, %v700_v61  ;;  %v671_v1 = vmul.f32 %v1596_v24, %v1440_v18  ;;  %v689_v4 = vmul.f32 %v1598_v32, %v1448_v29  ;;  %v669_v18 = vmul.f32 %v1596_v24, %v1779_v62 }
 0x225   :  { %v695_v34 = vadd.f32 %v679_v2, %v661_v0  ;;  %v687_v29 = vmul.f32 %v1598_v32, %v1780_v35  ;;  %v732_v7 = vadd.f32 %v716_v8, %v698_v41 }
 0x226   :  { %v705_v31 = vadd.f32 %v689_v4, %v671_v1 }
 0x2f5   :  { %v1070_v63 = vpop.f32.mrb[4].mxu0 }
 0x2f6   :  { %v464_v58 = vpop.f32.mrb[5].mxu0 }
 0x2f7   :  { %v1071_v13 = vpop.f32.mrb[6].mxu0 }
 0x2f8   :  { %v496_v25 = vpack.c.bf16 %v1071_v13, %v1070_v63  ;;  %v467_v26 = vpop.f32.mrb[7].mxu0  ;;  %v688_v63 = vmul.f32 %v1598_v32, %v1442_v20  ;;  %v686_v20 = vmul.f32 %v1598_v32, %v1422_v55  ;;  %v1648_v13 = vstv %s972_s3 }
 0x2f9   :  { %v495_v60 = vpack.c.bf16 %v467_v26, %v464_v58  ;;  %v701_v58 = vadd.f32 %v685_v39, %v667_v36  ;;  %v694_v26 = vadd.f32 %v678_v22, %v660_v33  ;;  %v712_v55 = vmul.f32 %v1604_v44, %v1338_v5  ;;  %v1781_v36 = vld [vmem:[#allocation17_spill] sm:$0xff]  ;;  %v1782_v22 = vld [vmem:[#allocation15_spill] sm:$0xff] }
 0x2fa   :  { %v704_v53 = vadd.f32 %v688_v63, %v670_v46  ;;  %v723_v39 = vmul.f32 %v1604_v44, %v1781_v36  ;;  %v752_v27 = vadd.f32 %v1648_v13, %v734_v45  ;;  %v703_v33 = vadd.f32 %v687_v29, %v669_v18 }
 0x2fb   :  { %1072 = vmatprep.subr.bf16.mxu0 %v495_v60  ;;  %1092 = vmatprep.subr.bf16.mxu1 %v495_v60  ;;  %v735_v61 = vadd.f32 %v719_v28, %v701_v58  ;;  %v750_v41 = vadd.f32 %v1648_v13, %v732_v7  ;;  %v674_v58 = vmul.f32 %v1596_v24, %v1499_v37 }
 0x2fc   :  { %1073 = vmatpush3.bf16.msra.mxu0 %v495_v60  ;;  %1094 = vmatpush3.bf16.msra.mxu1 %v495_v60  ;;  %v697_v60 = vadd.f32 %v681_v9, %v663_v3  ;;  %v721_v3 = vmul.f32 %v1604_v44, %v1782_v22  ;;  %v692_v45 = vmul.f32 %v1598_v32, %v1505_v57 }
 0x2fd   :  { %1074 = vmatprep.subr.bf16.mxu0 %v496_v25  ;;  %1093 = vmatprep.subr.bf16.mxu1 %v496_v25  ;;  %v753_v28 = vadd.f32 %v1648_v13, %v735_v61  ;;  %v672_v29 = vmul.f32 %v1596_v24, %v1461_v42 }
 0x300   :  { %1075 = vmatpush3.bf16.msra.mxu0 %v496_v25  ;;  %1095 = vmatpush3.bf16.msra.mxu1 %v496_v25  ;;  %v696_v25 = vadd.f32 %v680_v40, %v662_v47  ;;  %v733_v47 = vadd.f32 %v717_v10, %v699_v48 }
 0x302   :  { %v730_v43 = vadd.f32 %v714_v6, %v696_v25  ;;  %v751_v2 = vadd.f32 %v1648_v13, %v733_v47 }
 0x303   :  { %1081 = vmatmul.mubr.msk.bf16.vlgmr.msra.gmra.mrb[4].mxu1 %vm423_vm0, %v1115_v52  ;;  %1077 = vmatmul.mubr.msk.bf16.vlgmr.msra.gmra.mrb[8].mxu0 %vm423_vm0, %v1119_v19  ;;  %v715_v52 = vmul.f32 %v1604_v44, %v1358_v15  ;;  %v1776_v19 = vld [vmem:[#allocation16_spill] sm:$0xff]  ;;  %v728_v15 = vadd.f32 %v712_v55, %v694_v26  ;;  %v737_v26 = vadd.f32 %v721_v3, %v703_v33  ;;  %v1783_v33 = vld [vmem:[#allocation18_spill] sm:$0xff] }
 0x304   :  { %1084 = vmatprep.mubr.msk.bf16.mxu1 %vm423_vm0, %v1116_v59  ;;  %v722_v14 = vmul.f32 %v1604_v44, %v1776_v19  ;;  %v702_v59 = vadd.f32 %v686_v20, %v668_v17  ;;  %v748_v9 = vadd.f32 %v1648_v13, %v730_v43  ;;  %v739_v17 = vadd.f32 %v723_v39, %v705_v31 }
 0x305   :  { %v731_v21 = vadd.f32 %v715_v52, %v697_v60  ;;  %v746_v8 = vadd.f32 %v1648_v13, %v728_v15  ;;  %v708_v19 = vadd.f32 %v692_v45, %v674_v58  ;;  %v690_v15 = vmul.f32 %v1598_v32, %v1471_v51 }
 0x306   :  { %v738_v40 = vadd.f32 %v722_v14, %v704_v53  ;;  %v726_v14 = vmul.f32 %v1604_v44, %v1517_v11  ;;  %v675_v39 = vmul.f32 %v1596_v24, %v1501_v38  ;;  %v724_v51 = vmul.f32 %v1604_v44, %v1482_v12 }
 0x307   :  { %v749_v20 = vadd.f32 %v1648_v13, %v731_v21  ;;  %v693_v21 = vmul.f32 %v1598_v32, %v1513_v30  ;;  %v691_v38 = vmul.f32 %v1598_v32, %v1783_v33 }
 0x308   :  { %v756_v48 = vadd.f32 %v1648_v13, %v738_v40  ;;  %v742_v31 = vadd.f32 %v726_v14, %v708_v19 }
 0x309   :  { %v709_v12 = vadd.f32 %v693_v21, %v675_v39 }
 0x30a   :  { %v760_v30 = vadd.f32 %v1648_v13, %v742_v31 }
 0x30b   :  { %1085 = vmatmul.mubr.msk.bf16.gmra.mrb[8].mxu1 %vm423_vm0, %v1117_v49  ;;  %v1777_v49 = vld [vmem:[#allocation11_spill] sm:$0xff] }
 0x30c   :  { %1088 = vmatprep.mubr.msk.bf16.mxu1 %vm423_vm0, %v1120_v16  ;;  %v713_v16 = vmul.f32 %v1604_v44, %v1777_v49 }
 0x30e   :  { %v729_v46 = vadd.f32 %v713_v16, %v695_v34  ;;  %v757_v16 = vadd.f32 %v1648_v13, %v739_v17  ;;  %v725_v17 = vmul.f32 %v1604_v44, %v1488_v54 }
 0x310   :  { %v747_v6 = vadd.f32 %v1648_v13, %v729_v46 }
 0x313   :  { %1089 = vmatmul.mubr.msk.bf16.gmra.mrb[12].mxu1 %vm423_vm0, %v1121_v23  ;;  %v1778_v23 = vld [vmem:[#allocation14_spill] sm:$0xff] }
 0x314   :  { %v720_v5 = vmul.f32 %v1604_v44, %v1778_v23 }
 0x316   :  { %v736_v63 = vadd.f32 %v720_v5, %v702_v59 }
 0x318   :  { %v754_v37 = vadd.f32 %v1648_v13, %v736_v63  ;;  %v673_v63 = vmul.f32 %v1596_v24, %v1469_v50  ;;  %v727_v50 = vmul.f32 %v1604_v44, %v1524_v56 }
 0x31a   :  { %v707_v32 = vadd.f32 %v691_v38, %v673_v63 }
 0x3d6   :  { %v1082_v0 = vpop.f32.mrb[4].mxu1  ;;  %v1078_v25 = vpop.f32.mrb[8].mxu0 }
 0x3d7   :  { %v768_v10 = vadd.f32 %v1082_v0, %v752_v27  ;;  %v611_v53 = vpop.f32.mrb[5].mxu1  ;;  %v764_v55 = vadd.f32 %v1078_v25, %v748_v9  ;;  %v595_v57 = vpop.f32.mrb[9].mxu0  ;;  %v755_v27 = vadd.f32 %v1648_v13, %v737_v26  ;;  %v706_v9 = vadd.f32 %v690_v15, %v672_v29 }
 0x3d8   :  { %v766_v1 = vadd.f32 %v750_v41, %v611_v53  ;;  %v1083_v4 = vpop.f32.mrb[6].mxu1  ;;  %v762_v60 = vadd.f32 %v746_v8, %v595_v57  ;;  %v1079_v52 = vpop.f32.mrb[10].mxu0 }
 0x3d9   :  { %v979_v59 = vmul.f32 -1.442695, %v768_v10  ;;  %v769_v34 = vadd.f32 %v1083_v4, %v753_v28  ;;  %v614_v49 = vpop.f32.mrb[7].mxu1  ;;  %v765_v23 = vadd.f32 %v1079_v52, %v749_v20  ;;  %v598_v5 = vpop.f32.mrb[11].mxu0  ;;  %v975_v7 = vmul.f32 -1.442695, %v764_v55 }
 0x3da   :  { %v977_v62 = vmul.f32 -1.442695, %v766_v1  ;;  %v767_v18 = vadd.f32 %v751_v2, %v614_v49  ;;  %v763_v35 = vadd.f32 %v747_v6, %v598_v5  ;;  %v973_v61 = vmul.f32 -1.442695, %v762_v60 }
 0x3db   :  { %1138 = vpow2.f32 %v979_v59  ;;  %v980_v43 = vmul.f32 -1.442695, %v769_v34  ;;  %v976_v36 = vmul.f32 -1.442695, %v765_v23  ;;  %v740_v2 = vadd.f32 %v724_v51, %v706_v9 }
 0x3dc   :  { %1140 = vpow2.f32 %v977_v62  ;;  %v978_v11 = vmul.f32 -1.442695, %v767_v18  ;;  %v974_v47 = vmul.f32 -1.442695, %v763_v35  ;;  %v743_v10 = vadd.f32 %v727_v50, %v709_v12 }
 0x3dd   :  { %1142 = vpow2.f32 %v980_v43  ;;  %v741_v55 = vadd.f32 %v725_v17, %v707_v32  ;;  %v758_v60 = vadd.f32 %v1648_v13, %v740_v2 }
 0x3de   :  { %1144 = vpow2.f32 %v978_v11  ;;  %v1086_v42 = vpop.f32.mrb[8].mxu1  ;;  %v761_v59 = vadd.f32 %v1648_v13, %v743_v10 }
 0x3df   :  { %v772_v40 = vadd.f32 %v1086_v42, %v756_v48  ;;  %v627_v46 = vpop.f32.mrb[9].mxu1  ;;  %1146 = vpow2.f32 %v975_v7  ;;  %v759_v23 = vadd.f32 %v1648_v13, %v741_v55 }
 0x3e0   :  { %v770_v22 = vadd.f32 %v754_v37, %v627_v46  ;;  %v1087_v3 = vpop.f32.mrb[10].mxu1  ;;  %1148 = vpow2.f32 %v973_v61 }
 0x3e1   :  { %v983_v41 = vmul.f32 -1.442695, %v772_v40  ;;  %v773_v8 = vadd.f32 %v1087_v3, %v757_v16  ;;  %v630_v58 = vpop.f32.mrb[11].mxu1  ;;  %1150 = vpow2.f32 %v976_v36  ;;  %v1719_v36 = vld [vmem:[%s1758_s6] ss:$0 sm:$0xff]  ;;  %s1268_s6 = smov [#allocation7]  }
 0x3e2   :  { %v981_v45 = vmul.f32 -1.442695, %v770_v22  ;;  %v771_v28 = vadd.f32 %v755_v27, %v630_v58  ;;  %1152 = vpow2.f32 %v974_v47  ;;  %s919_s19 = sshll.u32 %s1268_s6, 4  ;;  %s920_s19 = int_to_ptr.vmem [resolvable:$true] %s919_s19 }
 0x3e3   :  { %1154 = vpow2.f32 %v983_v41  ;;  %v984_v24 = vmul.f32 -1.442695, %v773_v8  ;;  %s1236_s1 = scalar_lea.vmem %s920_s19, 2048  ;;  %p1241_p0 = scmp.lt.s32.totalorder %s920_s19, %s920_s19 }
 0x3e4   :  { %1156 = vpow2.f32 %v981_v45  ;;  %v982_v20 = vmul.f32 -1.442695, %v771_v28  ;;  %p1237_p13 = scmp.ne.s32.totalorder %s920_s19, %s1236_s1  ;;  %p1242_p1 = scmp.lt.s32.totalorder %s1236_s1, %s1236_s1 }
 0x3e5   :  { %v1139_v0 = vpop.eup %1138  ;;  %1158 = vpow2.f32 %v984_v24 }
 0x3e6   :  { %v1141_v48 = vpop.eup %1140  ;;  %v832_v25 = vadd.f32 1.0, %v1139_v0  ;;  %1160 = vpow2.f32 %v982_v20  ;;  %v1090_v6 = vpop.f32.mrb[12].mxu1  ;;  %p1243_p2 = por %p1242_p1, %p1241_p0 }
 0x3e7   :  { %v1143_v53 = vpop.eup %1142  ;;  %v830_v37 = vadd.f32 1.0, %v1141_v48  ;;  %v776_v26 = vadd.f32 %v1090_v6, %v760_v30  ;;  %v643_v56 = vpop.f32.mrb[13].mxu1 }
 0x3e8   :  { %v1145_v57 = vpop.eup %1144  ;;  %1162 = vrcp.f32 %v832_v25  ;;  %v833_v1 = vadd.f32 1.0, %v1143_v53  ;;  %v1091_v4 = vpop.f32.mrb[14].mxu1  ;;  %v774_v35 = vadd.f32 %v758_v60, %v643_v56  ;;  %p1244_p3 = pnand %p1243_p2, %p1237_p13 }
 0x3e9   :  { %v1147_v54 = vpop.eup %1146  ;;  %1164 = vrcp.f32 %v830_v37  ;;  %v831_v44 = vadd.f32 1.0, %v1145_v57  ;;  %v646_v52 = vpop.f32.mrb[15].mxu1  ;;  %v987_v16 = vmul.f32 -1.442695, %v776_v26  ;;  %v777_v7 = vadd.f32 %v1091_v4, %v761_v59 }
 0x3ea   :  { %v1149_v19 = vpop.eup %1148  ;;  %1166 = vrcp.f32 %v833_v1  ;;  %v828_v14 = vadd.f32 1.0, %v1147_v54  ;;  %v775_v61 = vadd.f32 %v759_v23, %v646_v52  ;;  %v985_v42 = vmul.f32 -1.442695, %v774_v35 }
 0x3eb   :  { %v1151_v34 = vpop.eup %1150  ;;  %1168 = vrcp.f32 %v831_v44  ;;  %v826_v49 = vadd.f32 1.0, %v1149_v19  ;;  %v988_v47 = vmul.f32 -1.442695, %v777_v7 }
 0x3ec   :  { %v1153_v5 = vpop.eup %1152  ;;  %1170 = vrcp.f32 %v828_v14  ;;  %v829_v62 = vadd.f32 1.0, %v1151_v34  ;;  %v986_v46 = vmul.f32 -1.442695, %v775_v61  ;;  %v1269_v14 = vmov 0.0  }
 0x3ed   :  { %v1155_v18 = vpop.eup %1154  ;;  %1172 = vrcp.f32 %v826_v49  ;;  %v827_v39 = vadd.f32 1.0, %v1153_v5 }
 0x3ee   :  { %v1157_v29 = vpop.eup %1156  ;;  %v836_v43 = vadd.f32 1.0, %v1155_v18  ;;  %1174 = vrcp.f32 %v829_v62 }
 0x3ef   :  { %v1159_v15 = vpop.eup %1158  ;;  %v834_v11 = vadd.f32 1.0, %v1157_v29  ;;  %1176 = vpow2.f32 %v987_v16 }
 0x3f0   :  { %v1161_v31 = vpop.eup %1160  ;;  %1178 = vrcp.f32 %v836_v43  ;;  %v837_v13 = vadd.f32 1.0, %v1159_v15 }
 0x3f1   :  { %1180 = vrcp.f32 %v834_v11  ;;  %v835_v21 = vadd.f32 1.0, %v1161_v31 }
 0x3f2   :  { %v1163_v27 = vpop.eup %1162  ;;  %1182 = vrcp.f32 %v837_v13 }
 0x3f3   :  { %v1165_v51 = vpop.eup %1164  ;;  %v887_v40 = vmul.f32 %v1163_v27, %v1719_v36  ;;  %1184 = vrcp.f32 %v835_v21 }
 0x3f4   :  { %v1167_v63 = vpop.eup %1166  ;;  %v885_v33 = vmul.f32 %v1165_v51, %v1719_v36  ;;  %1186 = vrcp.f32 %v827_v39 }
 0x3f5   :  { %v1169_v38 = vpop.eup %1168  ;;  %903 = vst [vmem:[#allocation7 + $0x30] sm:$0xff] %v887_v40  ;;  %v888_v22 = vmul.f32 %v1167_v63, %v1719_v36  ;;  %1188 = vpow2.f32 %v985_v42 }
 0x3f6   :  { %v1171_v3 = vpop.eup %1170  ;;  %901 = vst [vmem:[#allocation7 + $0x20] sm:$0xff] %v885_v33  ;;  %v886_v30 = vmul.f32 %v1169_v38, %v1719_v36  ;;  %1190 = vpow2.f32 %v988_v47 }
 0x3f7   :  { %v1173_v9 = vpop.eup %1172  ;;  %904 = vst [vmem:[#allocation7 + $0x38] sm:$0xff] %v888_v22  ;;  %v883_v41 = vmul.f32 %v1171_v3, %v1719_v36  ;;  %1192 = vpow2.f32 %v986_v46 }
 0x3f8   :  { %v1175_v8 = vpop.eup %1174  ;;  %902 = vst [vmem:[#allocation7 + $0x28] sm:$0xff] %v886_v30  ;;  %v881_v58 = vmul.f32 %v1173_v9, %v1719_v36 }
 0x3f9   :  { %v1177_v12 = vpop.eup %1176  ;;  %899 = vst [vmem:[#allocation7 + $0x10] sm:$0xff] %v883_v41  ;;  %v884_v45 = vmul.f32 %v1175_v8, %v1719_v36 }
 0x3fa   :  { %v1179_v28 = vpop.eup %1178  ;;  %897 = vst [vmem:[#allocation7] sm:$0xff] %v881_v58  ;;  %v840_v50 = vadd.f32 1.0, %v1177_v12 }
 0x3fb   :  { %v1181_v24 = vpop.eup %1180  ;;  %v891_v32 = vmul.f32 %v1179_v28, %v1719_v36  ;;  %900 = vst [vmem:[#allocation7 + $0x18] sm:$0xff] %v884_v45 }
 0x3fc   :  { %v1183_v17 = vpop.eup %1182  ;;  %v889_v20 = vmul.f32 %v1181_v24, %v1719_v36  ;;  %1194 = vrcp.f32 %v840_v50 }
 0x3fd   :  { %v1185_v0 = vpop.eup %1184  ;;  %907 = vst [vmem:[#allocation7 + $0x50] sm:$0xff] %v891_v32  ;;  %v892_v2 = vmul.f32 %v1183_v17, %v1719_v36 }
 0x3fe   :  { %v1187_v48 = vpop.eup %1186  ;;  %905 = vst [vmem:[#allocation7 + $0x40] sm:$0xff] %v889_v20  ;;  %v890_v25 = vmul.f32 %v1185_v0, %v1719_v36 }
 0x3ff   :  { %v1189_v6 = vpop.eup %1188  ;;  %908 = vst [vmem:[#allocation7 + $0x58] sm:$0xff] %v892_v2  ;;  %v882_v10 = vmul.f32 %v1187_v48, %v1719_v36 }
 0x400   :  { %v1191_v53 = vpop.eup %1190  ;;  %906 = vst [vmem:[#allocation7 + $0x48] sm:$0xff] %v890_v25  ;;  %v838_v37 = vadd.f32 1.0, %v1189_v6 }
 0x401   :  { %v1193_v26 = vpop.eup %1192  ;;  %898 = vst [vmem:[#allocation7 + $0x8] sm:$0xff] %v882_v10  ;;  %v841_v56 = vadd.f32 1.0, %v1191_v53 }
 0x402   :  { %1196 = vrcp.f32 %v838_v37  ;;  %v839_v55 = vadd.f32 1.0, %v1193_v26 }
 0x403   :  { %1198 = vrcp.f32 %v841_v56 }
 0x404   :  { %1200 = vrcp.f32 %v839_v55 }
 0x406   :  { %v1195_v57 = vpop.eup %1194 }
 0x407   :  { %v895_v1 = vmul.f32 %v1195_v57, %v1719_v36 }
 0x409   :  { %911 = vst [vmem:[#allocation7 + $0x70] sm:$0xff] %v895_v1 }
 0x40c   :  { %v1197_v4 = vpop.eup %1196 }
 0x40d   :  { %v1199_v54 = vpop.eup %1198  ;;  %v893_v44 = vmul.f32 %v1197_v4, %v1719_v36 }
 0x40e   :  { %v1201_v60 = vpop.eup %1200  ;;  %v896_v52 = vmul.f32 %v1199_v54, %v1719_v36 }
 0x40f   :  { %909 = vst [vmem:[#allocation7 + $0x60] sm:$0xff] %v893_v44  ;;  %v894_v19 = vmul.f32 %v1201_v60, %v1719_v36 }
 0x410   :  { %912 = vst [vmem:[#allocation7 + $0x78] sm:$0xff] %v896_v52 }
 0x411   :  { %913 = vst [vmem:[#allocation7 + $0x7f] sm:$0x1] %v1269_v14  ;;  %910 = vst [vmem:[#allocation7 + $0x68] sm:$0xff] %v894_v19 }
 0x412   :  { %1247 = shalt.err (!%p1244_p3)
}
 0x413   :  { %s1248_s2 = scalar_lea.hbm %s1759_s7, 2048 }
 0x414   :  { %p1249_p4 = scmp.ne.s32.totalorder %s1759_s7, %s1248_s2  ;;  %p1252_p5 = scmp.lt.u32.totalorder %s1248_s2, %s1759_s7 }
 0x416   :  { %p1254_p6 = pnand %p1252_p5, %p1249_p4 }
 0x418   :  { %1257 = shalt.err (!%p1254_p6)
}
 0x419   :  { %925 = dma.vmem_to_hbm [thread:$0]  %s920_s19, 2048, %s1759_s7, [#allocation4], %s1265_s5, %s1265_s5, %s1266_s14  }
 0x41a   :  { %1262 = dma.done.wait [#allocation4], 2048  }
 0x41b   :  { %1263 = vsyncadd [#allocation4], 4294965248 }
 0x41c   :  { %929 = vsyncpa [#allocation3], 1 }
 0x41d   :  { %930 = vsyncpa [#allocation4], 1 }
 0x41e   :  { %931 = vsyncpa [#allocation5], 1 }

</bundles_post_ra>
